<compile_context>
chip_gen: v6e
topology: v6e:2x2x1
jax: 0.10.0
libtpu: 0.0.40
codegen_flags: <defaults>
</compile_context>

<pallas_src>
import jax
import jax.numpy as jnp
from jax.experimental import pallas as pl
from jax.experimental.pallas import tpu as pltpu

S_DIM = 360      # state features
A_DIM = 2        # action features
IN_DIM = S_DIM + A_DIM          # 362
IN_PAD = 384                    # 362 padded up to a multiple of 128 lanes
H = 64           # hidden per branch
Q_DIM = 128      # concat hidden
TILE_B_DEFAULT = 1024


def _round_up(n, m):
    return ((n + m - 1) // m) * m


def qnet_kernel(xa_ref, w1_ref, b1_ref, wq_ref, bq_ref, wo_ref, bo_ref, out_ref):
    # Fused fc_s / fc_a: [x | a | 0] @ blockdiag(ws, wa) + [bs | ba], then ReLU.
    # (dropout == identity at inference)
    h = jnp.dot(xa_ref[...], w1_ref[...], preferred_element_type=jnp.float32)
    h = jnp.maximum(h + b1_ref[...], 0.0)

    # fc_q (128 -> 128) + ReLU.  Cast activation back to bf16 for the MXU,
    # keep accumulation and elementwise math in f32.
    q = jnp.dot(h.astype(wq_ref.dtype), wq_ref[...],
                preferred_element_type=jnp.float32)
    q = jnp.maximum(q + bq_ref[...], 0.0)

    # fc_out (128 -> 1).
    out = jnp.dot(q.astype(wo_ref.dtype), wo_ref[...],
                  preferred_element_type=jnp.float32)
    out_ref[...] = (out + bo_ref[...]).astype(out_ref.dtype)


def qnet_forward(x, a, params, *, tile_b=TILE_B_DEFAULT):
    B = x.shape[0]

    # Wrapper-side layout plumbing: concat + pad features to 384 lanes, bf16.
    xa = jnp.concatenate([x, a], axis=1)                       # (B, 362)
    xa = jnp.pad(xa, ((0, 0), (0, IN_PAD - IN_DIM)))           # (B, 384)
    xa = xa.astype(jnp.bfloat16)

    # Batch tiling: tile must be a multiple of 8 sublanes; pad B to a multiple
    # of the tile so the last block never reads/writes out of range.
    tile_b = _round_up(min(tile_b, _round_up(B, 8)), 8)
    b_pad = _round_up(B, tile_b)
    if b_pad != B:
        xa = jnp.pad(xa, ((0, b_pad - B), (0, 0)))

    grid = (pl.cdiv(b_pad, tile_b),)

    resident = lambda i: (0, 0)     # weights/biases: one block, stay in VMEM
    streamed = lambda i: (i, 0)     # x/out: tiled along batch

    flops = 2 * b_pad * (IN_PAD * Q_DIM + Q_DIM * Q_DIM + Q_DIM * 1)
    weight_bytes = (IN_PAD * Q_DIM + Q_DIM * Q_DIM + Q_DIM) * 2 + (2 * Q_DIM + 1) * 4
    bytes_accessed = b_pad * (IN_PAD * 2 + 4) + weight_bytes

    out = pl.pallas_call(
        qnet_kernel,
        out_shape=jax.ShapeDtypeStruct((b_pad, 1), jnp.float32),
        grid=grid,
        in_specs=[
            pl.BlockSpec((tile_b, IN_PAD), streamed),       # xa
            pl.BlockSpec((IN_PAD, Q_DIM), resident),        # W1  (blockdiag)
            pl.BlockSpec((1, Q_DIM), resident),             # b1
            pl.BlockSpec((Q_DIM, Q_DIM), resident),         # Wq
            pl.BlockSpec((1, Q_DIM), resident),             # bq
            pl.BlockSpec((Q_DIM, 1), resident),             # Wo
            pl.BlockSpec((1, 1), resident),                 # bo
        ],
        out_specs=pl.BlockSpec((tile_b, 1), streamed),
        compiler_params=pltpu.CompilerParams(
            dimension_semantics=("parallel",),
            vmem_limit_bytes=32 * 1024 * 1024,
        ),
        cost_estimate=pl.CostEstimate(
            flops=flops, transcendentals=0, bytes_accessed=bytes_accessed),
    )(xa,
      params["w1"], params["b1"],
      params["wq"], params["bq"],
      params["wo"], params["bo"])

    return out[:B]


def init_params(key):
    """Init mimicking PyTorch nn.Linear default (uniform +/- 1/sqrt(fan_in)).

    Weights are stored pre-transposed as [in, out] and cast to bf16; the fc_s
    and fc_a weights are packed into one block-diagonal (384, 128) matrix.
    Biases stay f32 (bias-add/ReLU run in f32 in-kernel).
    """
    def linear(k, fan_in, fan_out):
        kw, kb = jax.random.split(k)
        bound = 1.0 / jnp.sqrt(fan_in)
        w = jax.random.uniform(kw, (fan_in, fan_out), jnp.float32, -bound, bound)
        b = jax.random.uniform(kb, (1, fan_out), jnp.float32, -bound, bound)
        return w, b

    k1, k2, k3, k4 = jax.random.split(key, 4)
    ws, bs = linear(k1, S_DIM, H)        # fc_s: 360 -> 64
    wa, ba = linear(k2, A_DIM, H)        # fc_a: 2 -> 64
    wq, bq = linear(k3, Q_DIM, Q_DIM)    # fc_q: 128 -> 128
    wo, bo = linear(k4, Q_DIM, 1)        # fc_out: 128 -> 1

    # blockdiag(ws, wa) padded to 384 input rows (rows 362:384 are zero, so
    # the zero-padded input lanes contribute nothing).
    w1 = jnp.zeros((IN_PAD, Q_DIM), jnp.float32)
    w1 = w1.at[:S_DIM, :H].set(ws)
    w1 = w1.at[S_DIM:S_DIM + A_DIM, H:].set(wa)
    b1 = jnp.concatenate([bs, ba], axis=1)           # (1, 128)

    return {
        "w1": w1.astype(jnp.bfloat16), "b1": b1,
        "wq": wq.astype(jnp.bfloat16), "bq": bq,
        "wo": wo.astype(jnp.bfloat16), "bo": bo,
    }


def qnet_ref(x, a, p):
    """Pure-JAX reference using the same bf16-rounded weights/inputs."""
    xa = jnp.concatenate([x, a], axis=1)
    xa = jnp.pad(xa, ((0, 0), (0, IN_PAD - IN_DIM)))
    xa = xa.astype(jnp.bfloat16).astype(jnp.float32)
    w1 = p["w1"].astype(jnp.float32)
    wq = p["wq"].astype(jnp.float32)
    wo = p["wo"].astype(jnp.float32)
    h = jnp.maximum(xa @ w1 + p["b1"], 0.0)
    q = jnp.maximum(h @ wq + p["bq"], 0.0)
    return q @ wo + p["bo"]


if __name__ == "__main__":
    key = jax.random.PRNGKey(0)
    kx, ka, kp = jax.random.split(key, 3)

    B = 8
    x = jax.random.normal(kx, (B, S_DIM), jnp.float32)
    a = jax.random.normal(ka, (B, A_DIM), jnp.float32)
    params = init_params(kp)

    out = qnet_forward(x, a, params)
    out = jax.block_until_ready(out)

    ref = qnet_ref(x, a, params)
    assert out.shape == (B, 1), out.shape
    assert jnp.allclose(out, ref, atol=2e-2, rtol=2e-2), "mismatch vs reference"

    print("KERNEL_OK")
</pallas_src>

<mosaic_0001>
module attributes {stable_mosaic.version = 11 : i64} {
  func.func @qnet_kernel(%arg0: i32, %arg1: memref<8x384xbf16, #tpu.memory_space<vmem>>, %arg2: memref<384x128xbf16, #tpu.memory_space<vmem>>, %arg3: memref<1x128xf32, #tpu.memory_space<vmem>>, %arg4: memref<128x128xbf16, #tpu.memory_space<vmem>>, %arg5: memref<1x128xf32, #tpu.memory_space<vmem>>, %arg6: memref<128x1xbf16, #tpu.memory_space<vmem>>, %arg7: memref<1x1xf32, #tpu.memory_space<vmem>>, %arg8: memref<8x1xf32, #tpu.memory_space<vmem>>) attributes {dimension_semantics = [#tpu.dimension_semantics<parallel>], iteration_bounds = array<i64: 1>, scalar_prefetch = 0 : i64, scratch_operands = 0 : i64, tpu.core_type = #tpu.core_type<tc>, window_params = [{transform_indices = @transform_0, window_bounds = array<i64: 8, 384>}, {pipeline_mode = #tpu.pipeline_mode<synchronous>, transform_indices = @transform_1, window_bounds = array<i64: 384, 128>}, {pipeline_mode = #tpu.pipeline_mode<synchronous>, transform_indices = @transform_2, window_bounds = array<i64: 1, 128>}, {pipeline_mode = #tpu.pipeline_mode<synchronous>, transform_indices = @transform_3, window_bounds = array<i64: 128, 128>}, {pipeline_mode = #tpu.pipeline_mode<synchronous>, transform_indices = @transform_4, window_bounds = array<i64: 1, 128>}, {pipeline_mode = #tpu.pipeline_mode<synchronous>, transform_indices = @transform_5, window_bounds = array<i64: 128, 1>}, {pipeline_mode = #tpu.pipeline_mode<synchronous>, transform_indices = @transform_6, window_bounds = array<i64: 1, 1>}, {transform_indices = @transform_7, window_bounds = array<i64: 8, 1>}]} {
    %c0 = arith.constant 0 : index
    %c0_0 = arith.constant 0 : index
    %0 = vector.load %arg1[%c0, %c0_0] : memref<8x384xbf16, #tpu.memory_space<vmem>>, vector<8x384xbf16>
    %c0_1 = arith.constant 0 : index
    %c0_2 = arith.constant 0 : index
    %1 = vector.load %arg2[%c0_1, %c0_2] : memref<384x128xbf16, #tpu.memory_space<vmem>>, vector<384x128xbf16>
    %cst = arith.constant dense<0.000000e+00> : vector<8x128xf32>
    %2 = tpu.matmul %0, %1, %cst {dimension_numbers = #tpu.dot_dimension_numbers<[1], [0], [0], [1], [0, 0, 1, 1], [], []>} : vector<8x384xbf16>, vector<384x128xbf16>, vector<8x128xf32> -> vector<8x128xf32>
    %c0_3 = arith.constant 0 : index
    %c0_4 = arith.constant 0 : index
    %3 = vector.load %arg3[%c0_3, %c0_4] : memref<1x128xf32, #tpu.memory_space<vmem>>, vector<1x128xf32>
    %4 = vector.broadcast %3 : vector<1x128xf32> to vector<8x128xf32>
    %5 = arith.addf %2, %4 : vector<8x128xf32>
    %cst_5 = arith.constant 0.000000e+00 : f32
    %6 = vector.broadcast %cst_5 : f32 to vector<8x128xf32>
    %7 = arith.maximumf %5, %6 : vector<8x128xf32>
    %8 = arith.truncf %7 : vector<8x128xf32> to vector<8x128xbf16>
    %c0_6 = arith.constant 0 : index
    %c0_7 = arith.constant 0 : index
    %9 = vector.load %arg4[%c0_6, %c0_7] : memref<128x128xbf16, #tpu.memory_space<vmem>>, vector<128x128xbf16>
    %cst_8 = arith.constant dense<0.000000e+00> : vector<8x128xf32>
    %10 = tpu.matmul %8, %9, %cst_8 {dimension_numbers = #tpu.dot_dimension_numbers<[1], [0], [0], [1], [0, 0, 1, 1], [], []>} : vector<8x128xbf16>, vector<128x128xbf16>, vector<8x128xf32> -> vector<8x128xf32>
    %c0_9 = arith.constant 0 : index
    %c0_10 = arith.constant 0 : index
    %11 = vector.load %arg5[%c0_9, %c0_10] : memref<1x128xf32, #tpu.memory_space<vmem>>, vector<1x128xf32>
    %12 = vector.broadcast %11 : vector<1x128xf32> to vector<8x128xf32>
    %13 = arith.addf %10, %12 : vector<8x128xf32>
    %cst_11 = arith.constant 0.000000e+00 : f32
    %14 = vector.broadcast %cst_11 : f32 to vector<8x128xf32>
    %15 = arith.maximumf %13, %14 : vector<8x128xf32>
    %16 = arith.truncf %15 : vector<8x128xf32> to vector<8x128xbf16>
    %c0_12 = arith.constant 0 : index
    %c0_13 = arith.constant 0 : index
    %17 = vector.load %arg6[%c0_12, %c0_13] : memref<128x1xbf16, #tpu.memory_space<vmem>>, vector<128x1xbf16>
    %cst_14 = arith.constant dense<0.000000e+00> : vector<8x1xf32>
    %18 = tpu.matmul %16, %17, %cst_14 {dimension_numbers = #tpu.dot_dimension_numbers<[1], [0], [0], [1], [0, 0, 1, 1], [], []>} : vector<8x128xbf16>, vector<128x1xbf16>, vector<8x1xf32> -> vector<8x1xf32>
    %c0_15 = arith.constant 0 : index
    %c0_16 = arith.constant 0 : index
    %19 = vector.load %arg7[%c0_15, %c0_16] : memref<1x1xf32, #tpu.memory_space<vmem>>, vector<1x1xf32>
    %20 = vector.broadcast %19 : vector<1x1xf32> to vector<8x1xf32>
    %21 = arith.addf %18, %20 : vector<8x1xf32>
    %c0_17 = arith.constant 0 : index
    %c0_18 = arith.constant 0 : index
    %22 = vector.load %arg8[%c0_17, %c0_18] : memref<8x1xf32, #tpu.memory_space<vmem>>, vector<8x1xf32>
    tpu.vector_store %arg8[%c0_17, %c0_18], %21 {strides = array<i32>} : memref<8x1xf32, #tpu.memory_space<vmem>>, vector<8x1xf32>,
    return
  }
  func.func @transform_0(%arg0: i32) -> (i32, i32) {
    %c0_i32 = arith.constant 0 : i32
    %c0_i32_0 = arith.constant 0 : i32
    return %arg0, %c0_i32 : i32, i32
  }
  func.func @transform_1(%arg0: i32) -> (i32, i32) {
    %c0_i32 = arith.constant 0 : i32
    %c0_i32_0 = arith.constant 0 : i32
    %c0_i32_1 = arith.constant 0 : i32
    return %c0_i32, %c0_i32_0 : i32, i32
  }
  func.func @transform_2(%arg0: i32) -> (i32, i32) {
    %c0_i32 = arith.constant 0 : i32
    %c0_i32_0 = arith.constant 0 : i32
    %c0_i32_1 = arith.constant 0 : i32
    return %c0_i32, %c0_i32_0 : i32, i32
  }
  func.func @transform_3(%arg0: i32) -> (i32, i32) {
    %c0_i32 = arith.constant 0 : i32
    %c0_i32_0 = arith.constant 0 : i32
    %c0_i32_1 = arith.constant 0 : i32
    return %c0_i32, %c0_i32_0 : i32, i32
  }
  func.func @transform_4(%arg0: i32) -> (i32, i32) {
    %c0_i32 = arith.constant 0 : i32
    %c0_i32_0 = arith.constant 0 : i32
    %c0_i32_1 = arith.constant 0 : i32
    return %c0_i32, %c0_i32_0 : i32, i32
  }
  func.func @transform_5(%arg0: i32) -> (i32, i32) {
    %c0_i32 = arith.constant 0 : i32
    %c0_i32_0 = arith.constant 0 : i32
    %c0_i32_1 = arith.constant 0 : i32
    return %c0_i32, %c0_i32_0 : i32, i32
  }
  func.func @transform_6(%arg0: i32) -> (i32, i32) {
    %c0_i32 = arith.constant 0 : i32
    %c0_i32_0 = arith.constant 0 : i32
    %c0_i32_1 = arith.constant 0 : i32
    return %c0_i32, %c0_i32_0 : i32, i32
  }
  func.func @transform_7(%arg0: i32) -> (i32, i32) {
    %c0_i32 = arith.constant 0 : i32
    %c0_i32_0 = arith.constant 0 : i32
    return %arg0, %c0_i32 : i32, i32
  }
}

</mosaic_0001>

<bundles_post_ra>
// kernel: tpu_custom_call.1
= control target key start
LH: loop header
LB: loop body
LE: loop exit
PB: predicated region body
PF: predicated region fallthrough
CT: control target
= control target key end

     0   :  { %s971_s0 = inlined_call_operand.hbm [shape: bf16[8,384], index: 0, kind: input, shape index: {}]   ;;  %s972_s1 = inlined_call_operand.hbm [shape: bf16[384,128], index: 1, kind: input, shape index: {}]   ;;  %s973_s2 = inlined_call_operand.vmem [shape: f32[1,128], index: 2, kind: input, shape index: {}]   ;;  %s974_s3 = inlined_call_operand.vmem [shape: bf16[128,128], index: 3, kind: input, shape index: {}]   ;;  %s975_s4 = inlined_call_operand.vmem [shape: f32[1,128], index: 4, kind: input, shape index: {}]   ;;  %s976_s5 = inlined_call_operand.vmem [shape: bf16[128,1], index: 5, kind: input, shape index: {}]   ;;  %s977_s6 = inlined_call_operand.<no memory space> [shape: f32[1,1], index: 6, kind: input, shape index: {}]   ;;  %s978_s7 = inlined_call_operand.vmem [shape: f32[8,1], index: 7, kind: output, shape index: {}]  }
   0x1   :  { %v12_v0 = vstv %s977_s6 }
   0x2   :  { %13 = vst [vmem:[#allocation2] sm:$0x1] %v12_v0 }
   0x3   :  { %14 = vsyncpa [#allocation4], 0 }
   0x4   :  { %15 = vsyncpa [#allocation6], 0  ;;  %s829_s26 = smov [#allocation3]   ;;  %s830_s28 = smov [#allocation5]  }
   0x5   :  { %s22_s27 = sshll.u32 %s829_s26, 4  ;;  %s31_s29 = sshll.u32 %s830_s28, 4  ;;  %s23_s27 = int_to_ptr.vmem [resolvable:$true] %s22_s27  ;;  %s32_s29 = int_to_ptr.vmem [resolvable:$true] %s31_s29 }
   0x6   :  { %s793_s30 = scalar_lea.vmem %s23_s27, 192  ;;  %p798_p1 = scmp.lt.s32.totalorder %s23_s27, %s23_s27 }
   0x7   :  { %p794_p0 = scmp.ne.s32.totalorder %s23_s27, %s793_s30  ;;  %p799_p2 = scmp.lt.s32.totalorder %s793_s30, %s793_s30 }
   0x9   :  { %p800_p3 = por %p799_p2, %p798_p1 }
   0xb   :  { %p801_p4 = pnand %p800_p3, %p794_p0 }
   0xd   :  { %804 = shalt.err (!%p801_p4)
}
   0xe   :  { %25 = dma.hbm_to_vmem [thread:$0]  %s971_s0, 192, %s23_s27, [#allocation4]  }
   0xf   :  { %s813_s6 = scalar_lea.vmem %s32_s29, 3072  ;;  %p818_p6 = scmp.lt.s32.totalorder %s32_s29, %s32_s29 }
  0x10   :  { %p814_p5 = scmp.ne.s32.totalorder %s32_s29, %s813_s6  ;;  %p819_p7 = scmp.lt.s32.totalorder %s813_s6, %s813_s6 }
  0x12   :  { %p820_p8 = por %p819_p7, %p818_p6 }
  0x14   :  { %p821_p9 = pnand %p820_p8, %p814_p5 }
  0x16   :  { %824 = shalt.err (!%p821_p9)
}
  0x17   :  { %s831_s10 = smov 64   ;;  %s832_s11 = smov 4  }
  0x18   :  { %37 = dma.hbm_to_vmem [thread:$0]  %s972_s1, 3072, %s32_s29, [#allocation6], %s831_s10, %s831_s10, %s832_s11  }
  0x19   :  { %825 = dma.done.wait [#allocation4], 192  }
  0x1a   :  { %826 = vsyncadd [#allocation4], 4294967104 }
  0x1b   :  { %827 = dma.done.wait [#allocation6], 3072  }
  0x1c   :  { %828 = vsyncadd [#allocation6], 4294964224  ;;  %v833_v1 = vmov 0.0   ;;  %vm834_vm0 = vmmov 0   ;;  %v742_v2 = vld [vmem:[#allocation5 + $0x78] sm:$0xff]   ;;  %v745_v5 = vld [vmem:[#allocation5 + $0x70] sm:$0xff]  }
  0x1d   :  { %676 = vmatprep.subr.bf16.mxu1 %v833_v1  ;;  %692 = vmatprep.mubr.msk.bf16.mxu1 %vm834_vm0, %v833_v1  ;;  %v743_v3 = vld [vmem:[#allocation5 + $0x38] sm:$0xff]   ;;  %v746_v6 = vld [vmem:[#allocation5 + $0x30] sm:$0xff]   ;;  %v748_v8 = vld [vmem:[#allocation5 + $0x68] sm:$0xff]   ;;  %vm573_vm1 = vcmask 7168  }
  0x1e   :  { %627 = vmatprep.subr.bf16.mxu0 %v742_v2  ;;  %v744_v4 = vld [vmem:[#allocation5 + $0xb8] sm:$0xff]   ;;  %v747_v7 = vld [vmem:[#allocation5 + $0xb0] sm:$0xff]   ;;  %v749_v9 = vld [vmem:[#allocation5 + $0x28] sm:$0xff]  }
  0x1f   :  { %628 = vmatpush3.bf16.msra.mxu0 %v743_v3  ;;  %677 = vmatpush3.bf16.msra.mxu1 %v744_v4  ;;  %v750_v10 = vld [vmem:[#allocation5 + $0xa8] sm:$0xff]   ;;  %v751_v11 = vld [vmem:[#allocation5 + $0x60] sm:$0xff]   ;;  %v754_v14 = vld [vmem:[#allocation5 + $0x58] sm:$0xff]  }
  0x20   :  { %629 = vmatprep.subr.bf16.mxu0 %v745_v5  ;;  %678 = vmatprep.subr.bf16.mxu1 %v833_v1  ;;  %v752_v12 = vld [vmem:[#allocation5 + $0x20] sm:$0xff]   ;;  %v755_v15 = vld [vmem:[#allocation5 + $0x18] sm:$0xff]   ;;  %v757_v17 = vld [vmem:[#allocation5 + $0x50] sm:$0xff]  }
  0x21   :  { %v753_v13 = vld [vmem:[#allocation5 + $0xa0] sm:$0xff]   ;;  %v756_v16 = vld [vmem:[#allocation5 + $0x98] sm:$0xff]   ;;  %v758_v18 = vld [vmem:[#allocation5 + $0x10] sm:$0xff]  }
  0x22   :  { %v759_v19 = vld [vmem:[#allocation5 + $0x90] sm:$0xff]   ;;  %v760_v20 = vld [vmem:[#allocation5 + $0x48] sm:$0xff]   ;;  %v763_v23 = vld [vmem:[#allocation5 + $0x40] sm:$0xff]  }
  0x23   :  { %630 = vmatpush3.bf16.msra.mxu0 %v746_v6  ;;  %679 = vmatpush3.bf16.msra.mxu1 %v747_v7  ;;  %v761_v21 = vld [vmem:[#allocation5 + $0x8] sm:$0xff]   ;;  %v55_v24 = vld [vmem:[#allocation3] sm:$0xff]  ;;  %v764_v26 = vld [vmem:[#allocation5] sm:$0xff]  }
  0x24   :  { %631 = vmatprep.subr.bf16.mxu0 %v748_v8  ;;  %680 = vmatprep.subr.bf16.mxu1 %v833_v1  ;;  %v762_v22 = vld [vmem:[#allocation5 + $0x88] sm:$0xff]   ;;  %v583_v25 = vcombine.high %v55_v24, %v55_v24  ;;  %v765_v27 = vld [vmem:[#allocation5 + $0x80] sm:$0xff]   ;;  %v768_v28 = vld [vmem:[#allocation3 + $0x8] ss:$0 sps:$4 sm:$0xff]   ;;  %v582_v30 = vcombine.low %v55_v24, %v55_v24 }
  0x25   :  { %v769_v29 = vld [vmem:[%s974_s3 + $0x38] sm:$0xff]   ;;  %v770_v31 = vld [vmem:[%s974_s3 + $0x30] sm:$0xff]   ;;  %v771_v32 = vld [vmem:[%s974_s3 + $0x28] sm:$0xff]  }
  0x26   :  { %299 = vmatprep.mubr.bf16.mxu0 %v583_v25  ;;  %v772_v33 = vld [vmem:[%s974_s3 + $0x20] sm:$0xff]   ;;  %v773_v34 = vld [vmem:[%s974_s3 + $0x18] sm:$0xff]   ;;  %v774_v35 = vld [vmem:[%s974_s3 + $0x10] sm:$0xff]  }
  0x27   :  { %632 = vmatpush3.bf16.msra.mxu0 %v749_v9  ;;  %681 = vmatpush3.bf16.msra.mxu1 %v750_v10  ;;  %v775_v36 = vld [vmem:[%s974_s3 + $0x8] sm:$0xff]   ;;  %v776_v37 = vld [vmem:[%s974_s3] sm:$0xff]   ;;  %v777_v38 = vld [vmem:[%s976_s5 + $0x38] sm:$0xff]  }
  0x28   :  { %633 = vmatprep.subr.bf16.mxu0 %v751_v11  ;;  %682 = vmatprep.subr.bf16.mxu1 %v833_v1  ;;  %v778_v39 = vld [vmem:[%s976_s5 + $0x30] sm:$0xff]   ;;  %v779_v40 = vld [vmem:[%s976_s5 + $0x28] sm:$0xff]   ;;  %v780_v41 = vld [vmem:[%s976_s5 + $0x20] sm:$0xff]  }
  0x29   :  { %v781_v42 = vld [vmem:[%s976_s5 + $0x18] sm:$0xff]   ;;  %v782_v43 = vld [vmem:[%s976_s5 + $0x10] sm:$0xff]   ;;  %v581_v46 = vld [vmem:[%s973_s2] ss:$0 sm:$0xff] }
  0x2a   :  { %v783_v58 = vld [vmem:[%s976_s5 + $0x8] sm:$0xff]   ;;  %v784_v59 = vld [vmem:[%s976_s5] sm:$0xff]  }
  0x2b   :  { %634 = vmatpush3.bf16.msra.mxu0 %v752_v12  ;;  %683 = vmatpush3.bf16.msra.mxu1 %v753_v13  ;;  %v609_v60 = vld [vmem:[%s975_s4] ss:$0 sm:$0xff] }
  0x2c   :  { %635 = vmatprep.subr.bf16.mxu0 %v754_v14  ;;  %684 = vmatprep.subr.bf16.mxu1 %v833_v1  ;;  %v618_v5 = vld [vmem:[#allocation2] ss:$0 sm:$0xff] }
  0x2f   :  { %636 = vmatpush3.bf16.msra.mxu0 %v755_v15  ;;  %685 = vmatpush3.bf16.msra.mxu1 %v756_v16 }
  0x30   :  { %637 = vmatprep.subr.bf16.mxu0 %v757_v17  ;;  %686 = vmatprep.subr.bf16.mxu1 %v833_v1 }
  0x33   :  { %638 = vmatpush3.bf16.msra.mxu0 %v758_v18  ;;  %687 = vmatpush3.bf16.msra.mxu1 %v759_v19 }
  0x34   :  { %639 = vmatprep.subr.bf16.mxu0 %v760_v20  ;;  %688 = vmatprep.subr.bf16.mxu1 %v833_v1 }
  0x37   :  { %640 = vmatpush3.bf16.msra.mxu0 %v761_v21  ;;  %689 = vmatpush3.bf16.msra.mxu1 %v762_v22 }
  0x38   :  { %641 = vmatprep.subr.bf16.mxu0 %v763_v23  ;;  %690 = vmatprep.subr.bf16.mxu1 %v833_v1 }
  0x3b   :  { %642 = vmatpush3.bf16.msra.mxu0 %v764_v26  ;;  %691 = vmatpush3.bf16.msra.mxu1 %v765_v27 }
  0x3c   :  { %696 = vmatprep.subr.bf16.mxu0 %v833_v1  ;;  %716 = vmatprep.subr.bf16.mxu1 %v833_v1 }
  0x3e   :  { %300 = vmatmul.mubr.bf16.vlgmr.msra.gmra.mxu0 %v582_v30  ;;  %693 = vmatmul.mubr.bf16.vlgmr.msra.gmra.mxu1 %v768_v28 }
  0x3f   :  { %697 = vmatpush3.bf16.msra.mxu0 %v769_v29  ;;  %712 = vmatprep.mubr.msk.bf16.mxu0 %vm834_vm0, %v833_v1 }
  0x40   :  { %698 = vmatprep.subr.bf16.mxu0 %v833_v1  ;;  %732 = vmatprep.mubr.msk.bf16.mxu1 %vm834_vm0, %v833_v1 }
  0x41   :  { %717 = vmatpush3.bf16.msra.mxu1 %v777_v38 }
  0x42   :  { %718 = vmatprep.subr.bf16.mxu1 %v833_v1 }
  0x43   :  { %699 = vmatpush3.bf16.msra.mxu0 %v770_v31 }
  0x44   :  { %700 = vmatprep.subr.bf16.mxu0 %v833_v1 }
  0x45   :  { %719 = vmatpush3.bf16.msra.mxu1 %v778_v39 }
  0x46   :  { %720 = vmatprep.subr.bf16.mxu1 %v833_v1 }
  0x47   :  { %701 = vmatpush3.bf16.msra.mxu0 %v771_v32 }
  0x48   :  { %702 = vmatprep.subr.bf16.mxu0 %v833_v1 }
  0x49   :  { %721 = vmatpush3.bf16.msra.mxu1 %v779_v40 }
  0x4a   :  { %722 = vmatprep.subr.bf16.mxu1 %v833_v1 }
  0x4b   :  { %703 = vmatpush3.bf16.msra.mxu0 %v772_v33 }
  0x4c   :  { %704 = vmatprep.subr.bf16.mxu0 %v833_v1 }
  0x4d   :  { %723 = vmatpush3.bf16.msra.mxu1 %v780_v41 }
  0x4e   :  { %724 = vmatprep.subr.bf16.mxu1 %v833_v1 }
  0x4f   :  { %705 = vmatpush3.bf16.msra.mxu0 %v773_v34 }
  0x50   :  { %706 = vmatprep.subr.bf16.mxu0 %v833_v1 }
  0x51   :  { %725 = vmatpush3.bf16.msra.mxu1 %v781_v42 }
  0x52   :  { %726 = vmatprep.subr.bf16.mxu1 %v833_v1 }
  0x53   :  { %707 = vmatpush3.bf16.msra.mxu0 %v774_v35 }
  0x54   :  { %708 = vmatprep.subr.bf16.mxu0 %v833_v1 }
  0x55   :  { %727 = vmatpush3.bf16.msra.mxu1 %v782_v43 }
  0x56   :  { %728 = vmatprep.subr.bf16.mxu1 %v833_v1 }
  0x57   :  { %709 = vmatpush3.bf16.msra.mxu0 %v775_v36 }
  0x58   :  { %710 = vmatprep.subr.bf16.mxu0 %v833_v1 }
  0x59   :  { %729 = vmatpush3.bf16.msra.mxu1 %v783_v58 }
  0x5a   :  { %730 = vmatprep.subr.bf16.mxu1 %v833_v1 }
  0x5b   :  { %711 = vmatpush3.bf16.msra.mxu0 %v776_v37 }
  0x5d   :  { %731 = vmatpush3.bf16.msra.mxu1 %v784_v59 }
  0xfe   :  { %v643_v44 = vpop.f32.mrf.mxu0  ;;  %v341_v45 = vpop.f32.mrf.mxu1 }
 0x100   :  { %v644_v47 = vpop.f32.mrf.mxu0  ;;  %v694_v49 = vpop.f32.mrf.mxu1 }
 0x101   :  { %v645_v48 = vadd.f32 %v644_v47, %v643_v44 }
 0x102   :  { %v646_v50 = vpop.f32.mrf.mxu0  ;;  %v344_v52 = vpop.f32.mrf.mxu1 }
 0x103   :  { %v302_v51 = vadd.f32 %v645_v48, %v581_v46 }
 0x104   :  { %v647_v53 = vpop.f32.mrf.mxu0  ;;  %v695_v55 = vpop.f32.mrf.mxu1 }
 0x105   :  { %v342_v54 = vadd.f32 %v341_v45, %v302_v51 }
 0x107   :  { %v347_v56 = vmax.f32 %v342_v54, 0.0 }
 0x109   :  { %v348_v57 = vpack.c.bf16 %v347_v56, %v347_v56 }
 0x10b   :  { %713 = vmatmul.mubr.bf16.vlgmr.msra.gmra.mxu0 %v348_v57 }
 0x1cb   :  { %v454_v61 = vpop.f32.mrf.mxu0 }
 0x1cc   :  { %v455_v62 = vadd.f32 %v609_v60, %v454_v61 }
 0x1cd   :  { %v714_v63 = vpop.f32.mrf.mxu0 }
 0x1ce   :  { %v460_v0 = vmax.f32 %v455_v62, 0.0 }
 0x1cf   :  { %v457_v2 = vpop.f32.mrf.mxu0 }
 0x1d0   :  { %v461_v3 = vpack.c.bf16 %v460_v0, %v460_v0 }
 0x1d1   :  { %v715_v4 = vpop.f32.mrf.mxu0 }
 0x1d2   :  { %733 = vmatmul.mubr.bf16.vlgmr.msra.gmra.mxu1 %v461_v3 }
 0x292   :  { %v567_v6 = vpop.f32.mrf.mxu1 }
 0x293   :  { %v568_v1 = vadd.f32 %v618_v5, %v567_v6 }
 0x294   :  { %v734_v7 = vpop.f32.mrf.mxu1 }
 0x295   :  { %574 = vst.msk [vmem:[%s978_s7] sm:$0xff] %vm573_vm1, %v568_v1 }
 0x296   :  { %v570_v8 = vpop.f32.mrf.mxu1 }
 0x298   :  { %v735_v9 = vpop.f32.mrf.mxu1 }
 0x299   :  { %579 = vsyncpa [#allocation4], 1 }
 0x29a   :  { %580 = vsyncpa [#allocation6], 1 }

</bundles_post_ra>
